<compile_context>
chip_gen: v5e
topology: v5e:2x2
jax: 0.10.0
libtpu: 0.0.40
codegen_flags: <defaults>
</compile_context>

<pallas_src>
import functools
import math

import jax
import jax.numpy as jnp
from jax.experimental import pallas as pl
from jax.experimental.pallas import tpu as pltpu


def _conv_out_size(size, k, stride, padding, dilation):
    return (size + 2 * padding - dilation * (k - 1) - 1) // stride + 1


def _pick_row_tile(oh, ow, n_batch, max_rows=512, min_parallel=4):
    """Largest divisor of OH with toh*OW <= max_rows GEMM rows per tile, then
    shrunk (along divisors) until the grid has >= min_parallel blocks so both
    TensorCores (v7x) / megacore get work.  Always divides OH exactly, so the
    output is never padded/sliced."""
    divisors = [d for d in range(1, oh + 1) if oh % d == 0]
    fitting = [d for d in divisors if d * ow <= max_rows]
    toh = max(fitting) if fitting else 1
    while n_batch * (oh // toh) < min_parallel:
        smaller = [d for d in divisors if d < toh]
        if not smaller:
            break
        toh = max(smaller)
    return toh


# ----------------------------------------------------------------------------
# Kernel: one batch image is VMEM-resident; each grid step computes one tile
# of output rows as kh*kw small GEMMs (dot over the 2*Cin packed-complex
# channels), accumulating in registers on top of the packed bias.
# ----------------------------------------------------------------------------
def _complex_conv_kernel(x_ref, w_ref, b_ref, o_ref, *, toh, ow, kh, kw, dil):
    # x_ref: (1, Hp, Wp, 2Cin)      full padded image (resident across row tiles)
    # w_ref: (kh*kw, 2Cin, 2Cout)   packed complex weight, fully resident
    # b_ref: (1, 2Cout) f32         packed bias
    # o_ref: (1, toh, OW, 2Cout)    output row tile
    t = pl.program_id(1)
    row0 = t * toh                              # stride == 1
    cin2 = x_ref.shape[3]
    cout2 = o_ref.shape[3]
    m = toh * ow

    # Bias folded into the accumulator init (no separate epilogue add).
    acc = jnp.broadcast_to(b_ref[...].astype(jnp.float32), (m, cout2))
    for i in range(kh):
        for j in range(kw):
            win = x_ref[0, pl.ds(row0 + i * dil, toh), pl.ds(j * dil, ow), :]
            acc = acc + jnp.dot(win.reshape(m, cin2), w_ref[i * kw + j],
                                preferred_element_type=jnp.float32)

    o_ref[...] = acc.reshape(1, toh, ow, cout2).astype(o_ref.dtype)


# ----------------------------------------------------------------------------
# ComplexConv2d forward
# ----------------------------------------------------------------------------
def complex_conv2d(x, w_re, w_im, b_re, b_im, *, stride=1, padding=0,
                   dilation=1, compute_dtype=jnp.bfloat16, out_dtype=None):
    """x: (N, C_in, H, W, 2); w_*: (C_out, C_in, kH, kW); b_*: (C_out,).
    Returns (N, C_out, OH, OW, 2)."""
    if stride != 1:
        # TODO(synk): stride > 1 not implemented in the fused windowed path.
        raise NotImplementedError("Pallas ComplexConv2d kernel supports stride=1 only")
    # TODO(synk): groups > 1 not implemented (module default groups=1).
    N, Cin, H, W, _ = x.shape
    Cout, _, kh, kw = w_re.shape
    out_dtype = x.dtype if out_dtype is None else out_dtype

    OH = _conv_out_size(H, kh, 1, padding, dilation)
    OW = _conv_out_size(W, kw, 1, padding, dilation)

    # ---- input: cast to compute dtype FIRST, then NHWC-complex + spatial pad.
    #      Channel order along K is [re_0..re_{Cin-1}, im_0..im_{Cin-1}].
    xc = x.astype(compute_dtype)
    x_nhwc = jnp.transpose(xc, (0, 2, 3, 4, 1)).reshape(N, H, W, 2 * Cin)
    x_pad = jnp.pad(x_nhwc, ((0, 0), (padding, padding), (padding, padding), (0, 0)))
    Hp, Wp = H + 2 * padding, W + 2 * padding

    # ---- packed complex weight per tap:  [[ W_re, W_im],
    #                                       [-W_im, W_re]]
    #      so that [x_re | x_im] @ W_cat = [re | im].
    wre = jnp.transpose(w_re, (2, 3, 1, 0)).reshape(kh * kw, Cin, Cout).astype(compute_dtype)
    wim = jnp.transpose(w_im, (2, 3, 1, 0)).reshape(kh * kw, Cin, Cout).astype(compute_dtype)
    w_cat = jnp.concatenate(
        [jnp.concatenate([wre, wim], axis=2),
         jnp.concatenate([-wim, wre], axis=2)], axis=1)            # (kh*kw, 2Cin, 2Cout)
    # Each real conv carries its own bias (PyTorch module semantics).
    b_cat = jnp.concatenate([b_re - b_im, b_re + b_im]).reshape(1, 2 * Cout).astype(jnp.float32)

    toh = _pick_row_tile(OH, OW, N)
    grid = (N, OH // toh)

    # ---- VMEM budget (image + weights + out tile, double-buffered) ---------
    bpe = jnp.dtype(compute_dtype).itemsize
    img_bytes = Hp * Wp * 2 * Cin * bpe
    w_bytes = kh * kw * 2 * Cin * 2 * Cout * bpe
    out_bytes = toh * OW * 2 * Cout * jnp.dtype(out_dtype).itemsize
    acc_bytes = toh * OW * 2 * Cout * 4
    est = 2 * (img_bytes + w_bytes + out_bytes) + acc_bytes + (1 << 20)
    try:      # per-generation cap (v7x only has 64 MiB; v5e/v6e have 128 MiB)
        vmem_cap = int(pltpu.get_tpu_info().vmem_capacity_bytes)
    except Exception:
        vmem_cap = 64 << 20
    vmem_limit = int(min(max(2 * est, 32 << 20), int(0.75 * vmem_cap)))
    # TODO(synk): row-slab streaming (manual halo DMA) for images too large to
    # keep fully VMEM-resident.

    kernel = functools.partial(_complex_conv_kernel, toh=toh, ow=OW,
                               kh=kh, kw=kw, dil=dilation)

    y = pl.pallas_call(
        kernel,
        out_shape=jax.ShapeDtypeStruct((N, OH, OW, 2 * Cout), out_dtype),
        grid_spec=pltpu.PrefetchScalarGridSpec(
            num_scalar_prefetch=0,
            grid=grid,
            in_specs=[
                # Full padded image; block index does not depend on the row
                # axis, so it is DMA'd once per image and stays resident.
                pl.BlockSpec((1, Hp, Wp, 2 * Cin), lambda n, t: (n, 0, 0, 0)),
                pl.BlockSpec((kh * kw, 2 * Cin, 2 * Cout), lambda n, t: (0, 0, 0)),
                pl.BlockSpec((1, 2 * Cout), lambda n, t: (0, 0)),
            ],
            out_specs=pl.BlockSpec((1, toh, OW, 2 * Cout), lambda n, t: (n, t, 0, 0)),
        ),
        compiler_params=pltpu.CompilerParams(
            dimension_semantics=("parallel", "parallel"),
            vmem_limit_bytes=vmem_limit,
        ),
    )(x_pad, w_cat, b_cat)

    # [re | im] channel blocks -> NCHW-complex to match the PyTorch layout.
    # TODO(synk): a fused network could consume the NHWC(-complex) layout directly.
    y = y.reshape(N, OH, OW, 2, Cout)
    return jnp.transpose(y, (0, 4, 1, 2, 3))                      # (N, Cout, OH, OW, 2)


# ----------------------------------------------------------------------------
# Pure-JAX reference (lax.conv), exactly mirroring the PyTorch module.
# ----------------------------------------------------------------------------
def _ref_complex_conv2d(x, w_re, w_im, b_re, b_im, *, stride, padding, dilation):
    def conv(inp, w, b):
        out = jax.lax.conv_general_dilated(
            inp, w, window_strides=(stride, stride),
            padding=[(padding, padding), (padding, padding)],
            rhs_dilation=(dilation, dilation),
            dimension_numbers=("NCHW", "OIHW", "NCHW"))
        return out + b[None, :, None, None]
    xr, xi = x[..., 0], x[..., 1]
    real = conv(xr, w_re, b_re) - conv(xi, w_im, b_im)
    imag = conv(xi, w_re, b_re) + conv(xr, w_im, b_im)
    return jnp.stack((real, imag), axis=-1)


if __name__ == "__main__":
    root = jax.random.PRNGKey(0)

    def make_inputs(key, N, Cin, Cout, H, W, ksz):
        kx, kwr, kwi, kbr, kbi = jax.random.split(key, 5)
        x = jax.random.normal(kx, (N, Cin, H, W, 2), dtype=jnp.float32)
        bound = 1.0 / math.sqrt(Cin * ksz * ksz)
        w_re = jax.random.uniform(kwr, (Cout, Cin, ksz, ksz), jnp.float32, -bound, bound)
        w_im = jax.random.uniform(kwi, (Cout, Cin, ksz, ksz), jnp.float32, -bound, bound)
        b_re = jax.random.uniform(kbr, (Cout,), jnp.float32, -bound, bound)
        b_im = jax.random.uniform(kbi, (Cout,), jnp.float32, -bound, bound)
        return x, w_re, w_im, b_re, b_im

    k1, k2 = jax.random.split(root)

    # --- Case 1: ComplexConv2d(4, 8, kernel_size=3, padding=1), x (2,4,16,16,2)
    x, w_re, w_im, b_re, b_im = make_inputs(k1, 2, 4, 8, 16, 16, 3)
    ref = _ref_complex_conv2d(x, w_re, w_im, b_re, b_im, stride=1, padding=1, dilation=1)

    fwd_f32 = jax.jit(functools.partial(complex_conv2d, stride=1, padding=1, dilation=1,
                                        compute_dtype=jnp.float32))
    out_f32 = jax.block_until_ready(fwd_f32(x, w_re, w_im, b_re, b_im))
    assert out_f32.shape == (2, 8, 16, 16, 2), out_f32.shape
    assert jnp.allclose(out_f32, ref, atol=1e-3, rtol=1e-3)

    # Default MXU path: bf16 compute / f32 accumulate, bf16 writeback.
    fwd_bf16 = jax.jit(functools.partial(complex_conv2d, stride=1, padding=1, dilation=1,
                                         compute_dtype=jnp.bfloat16,
                                         out_dtype=jnp.bfloat16))
    out_bf16 = jax.block_until_ready(fwd_bf16(x, w_re, w_im, b_re, b_im))
    assert out_bf16.shape == (2, 8, 16, 16, 2), out_bf16.shape
    assert jnp.allclose(out_bf16.astype(jnp.float32), ref, atol=7e-2, rtol=7e-2)

    # --- Case 2: dilation=2, multiple row tiles, odd channel counts ---------
    x2, w_re2, w_im2, b_re2, b_im2 = make_inputs(k2, 1, 3, 5, 24, 16, 3)
    ref2 = _ref_complex_conv2d(x2, w_re2, w_im2, b_re2, b_im2,
                               stride=1, padding=2, dilation=2)
    fwd2 = jax.jit(functools.partial(complex_conv2d, stride=1, padding=2, dilation=2,
                                     compute_dtype=jnp.float32))
    out2 = jax.block_until_ready(fwd2(x2, w_re2, w_im2, b_re2, b_im2))
    assert out2.shape == ref2.shape, (out2.shape, ref2.shape)
    assert jnp.allclose(out2, ref2, atol=1e-3, rtol=1e-3)

    print("KERNEL_OK")
</pallas_src>

<mosaic_0001>
module attributes {stable_mosaic.version = 11 : i64} {
  func.func @_complex_conv_kernel(%arg0: i32, %arg1: i32, %arg2: memref<1x18x18x8xf32, #tpu.memory_space<vmem>>, %arg3: memref<9x8x16xf32, #tpu.memory_space<vmem>>, %arg4: memref<1x16xf32, #tpu.memory_space<vmem>>, %arg5: memref<1x8x16x16xf32, #tpu.memory_space<vmem>>) attributes {dimension_semantics = [#tpu.dimension_semantics<parallel>, #tpu.dimension_semantics<parallel>], iteration_bounds = array<i64: 2, 2>, scalar_prefetch = 0 : i64, scratch_operands = 0 : i64, tpu.core_type = #tpu.core_type<tc>, window_params = [{transform_indices = @transform_0, window_bounds = array<i64: 1, 18, 18, 8>}, {pipeline_mode = #tpu.pipeline_mode<synchronous>, transform_indices = @transform_1, window_bounds = array<i64: 9, 8, 16>}, {pipeline_mode = #tpu.pipeline_mode<synchronous>, transform_indices = @transform_2, window_bounds = array<i64: 1, 16>}, {transform_indices = @transform_3, window_bounds = array<i64: 1, 8, 16, 16>}]} {
    %c8_i32 = arith.constant 8 : i32
    %0 = arith.muli %arg1, %c8_i32 : i32
    %c0 = arith.constant 0 : index
    %c0_0 = arith.constant 0 : index
    %1 = vector.load %arg4[%c0, %c0_0] : memref<1x16xf32, #tpu.memory_space<vmem>>, vector<1x16xf32>
    %2 = vector.shape_cast %1 : vector<1x16xf32> to vector<1x16xf32>
    %3 = vector.broadcast %2 : vector<1x16xf32> to vector<128x16xf32>
    %c0_i32 = arith.constant 0 : i32
    %4 = arith.addi %0, %c0_i32 : i32
    %c0_1 = arith.constant 0 : index
    %5 = arith.index_cast %4 : i32 to index
    %c0_2 = arith.constant 0 : index
    %c0_3 = arith.constant 0 : index
    %6 = vector.load %arg2[%c0_1, %5, %c0_2, %c0_3] : memref<1x18x18x8xf32, #tpu.memory_space<vmem>>, vector<1x8x16x8xf32>
    %7 = vector.shape_cast %6 : vector<1x8x16x8xf32> to vector<8x16x8xf32>
    %8 = vector.shape_cast %7 : vector<8x16x8xf32> to vector<128x8xf32>
    %c0_4 = arith.constant 0 : index
    %c0_5 = arith.constant 0 : index
    %c0_6 = arith.constant 0 : index
    %9 = vector.load %arg3[%c0_4, %c0_5, %c0_6] : memref<9x8x16xf32, #tpu.memory_space<vmem>>, vector<1x8x16xf32>
    %10 = vector.shape_cast %9 : vector<1x8x16xf32> to vector<8x16xf32>
    %cst = arith.constant dense<0.000000e+00> : vector<128x16xf32>
    %11 = tpu.matmul %8, %10, %cst {dimension_numbers = #tpu.dot_dimension_numbers<[1], [0], [0], [1], [0, 0, 1, 1], [], []>} : vector<128x8xf32>, vector<8x16xf32>, vector<128x16xf32> -> vector<128x16xf32>
    %12 = arith.addf %3, %11 : vector<128x16xf32>
    %c0_i32_7 = arith.constant 0 : i32
    %13 = arith.addi %0, %c0_i32_7 : i32
    %c0_8 = arith.constant 0 : index
    %14 = arith.index_cast %13 : i32 to index
    %c1 = arith.constant 1 : index
    %c0_9 = arith.constant 0 : index
    %15 = vector.load %arg2[%c0_8, %14, %c1, %c0_9] : memref<1x18x18x8xf32, #tpu.memory_space<vmem>>, vector<1x8x16x8xf32>
    %16 = vector.shape_cast %15 : vector<1x8x16x8xf32> to vector<8x16x8xf32>
    %17 = vector.shape_cast %16 : vector<8x16x8xf32> to vector<128x8xf32>
    %c1_10 = arith.constant 1 : index
    %c0_11 = arith.constant 0 : index
    %c0_12 = arith.constant 0 : index
    %18 = vector.load %arg3[%c1_10, %c0_11, %c0_12] : memref<9x8x16xf32, #tpu.memory_space<vmem>>, vector<1x8x16xf32>
    %19 = vector.shape_cast %18 : vector<1x8x16xf32> to vector<8x16xf32>
    %cst_13 = arith.constant dense<0.000000e+00> : vector<128x16xf32>
    %20 = tpu.matmul %17, %19, %cst_13 {dimension_numbers = #tpu.dot_dimension_numbers<[1], [0], [0], [1], [0, 0, 1, 1], [], []>} : vector<128x8xf32>, vector<8x16xf32>, vector<128x16xf32> -> vector<128x16xf32>
    %21 = arith.addf %12, %20 : vector<128x16xf32>
    %c0_i32_14 = arith.constant 0 : i32
    %22 = arith.addi %0, %c0_i32_14 : i32
    %c0_15 = arith.constant 0 : index
    %23 = arith.index_cast %22 : i32 to index
    %c2 = arith.constant 2 : index
    %c0_16 = arith.constant 0 : index
    %24 = vector.load %arg2[%c0_15, %23, %c2, %c0_16] : memref<1x18x18x8xf32, #tpu.memory_space<vmem>>, vector<1x8x16x8xf32>
    %25 = vector.shape_cast %24 : vector<1x8x16x8xf32> to vector<8x16x8xf32>
    %26 = vector.shape_cast %25 : vector<8x16x8xf32> to vector<128x8xf32>
    %c2_17 = arith.constant 2 : index
    %c0_18 = arith.constant 0 : index
    %c0_19 = arith.constant 0 : index
    %27 = vector.load %arg3[%c2_17, %c0_18, %c0_19] : memref<9x8x16xf32, #tpu.memory_space<vmem>>, vector<1x8x16xf32>
    %28 = vector.shape_cast %27 : vector<1x8x16xf32> to vector<8x16xf32>
    %cst_20 = arith.constant dense<0.000000e+00> : vector<128x16xf32>
    %29 = tpu.matmul %26, %28, %cst_20 {dimension_numbers = #tpu.dot_dimension_numbers<[1], [0], [0], [1], [0, 0, 1, 1], [], []>} : vector<128x8xf32>, vector<8x16xf32>, vector<128x16xf32> -> vector<128x16xf32>
    %30 = arith.addf %21, %29 : vector<128x16xf32>
    %c1_i32 = arith.constant 1 : i32
    %31 = arith.addi %0, %c1_i32 : i32
    %c0_21 = arith.constant 0 : index
    %32 = arith.index_cast %31 : i32 to index
    %c0_22 = arith.constant 0 : index
    %c0_23 = arith.constant 0 : index
    %33 = vector.load %arg2[%c0_21, %32, %c0_22, %c0_23] : memref<1x18x18x8xf32, #tpu.memory_space<vmem>>, vector<1x8x16x8xf32>
    %34 = vector.shape_cast %33 : vector<1x8x16x8xf32> to vector<8x16x8xf32>
    %35 = vector.shape_cast %34 : vector<8x16x8xf32> to vector<128x8xf32>
    %c3 = arith.constant 3 : index
    %c0_24 = arith.constant 0 : index
    %c0_25 = arith.constant 0 : index
    %36 = vector.load %arg3[%c3, %c0_24, %c0_25] : memref<9x8x16xf32, #tpu.memory_space<vmem>>, vector<1x8x16xf32>
    %37 = vector.shape_cast %36 : vector<1x8x16xf32> to vector<8x16xf32>
    %cst_26 = arith.constant dense<0.000000e+00> : vector<128x16xf32>
    %38 = tpu.matmul %35, %37, %cst_26 {dimension_numbers = #tpu.dot_dimension_numbers<[1], [0], [0], [1], [0, 0, 1, 1], [], []>} : vector<128x8xf32>, vector<8x16xf32>, vector<128x16xf32> -> vector<128x16xf32>
    %39 = arith.addf %30, %38 : vector<128x16xf32>
    %c1_i32_27 = arith.constant 1 : i32
    %40 = arith.addi %0, %c1_i32_27 : i32
    %c0_28 = arith.constant 0 : index
    %41 = arith.index_cast %40 : i32 to index
    %c1_29 = arith.constant 1 : index
    %c0_30 = arith.constant 0 : index
    %42 = vector.load %arg2[%c0_28, %41, %c1_29, %c0_30] : memref<1x18x18x8xf32, #tpu.memory_space<vmem>>, vector<1x8x16x8xf32>
    %43 = vector.shape_cast %42 : vector<1x8x16x8xf32> to vector<8x16x8xf32>
    %44 = vector.shape_cast %43 : vector<8x16x8xf32> to vector<128x8xf32>
    %c4 = arith.constant 4 : index
    %c0_31 = arith.constant 0 : index
    %c0_32 = arith.constant 0 : index
    %45 = vector.load %arg3[%c4, %c0_31, %c0_32] : memref<9x8x16xf32, #tpu.memory_space<vmem>>, vector<1x8x16xf32>
    %46 = vector.shape_cast %45 : vector<1x8x16xf32> to vector<8x16xf32>
    %cst_33 = arith.constant dense<0.000000e+00> : vector<128x16xf32>
    %47 = tpu.matmul %44, %46, %cst_33 {dimension_numbers = #tpu.dot_dimension_numbers<[1], [0], [0], [1], [0, 0, 1, 1], [], []>} : vector<128x8xf32>, vector<8x16xf32>, vector<128x16xf32> -> vector<128x16xf32>
    %48 = arith.addf %39, %47 : vector<128x16xf32>
    %c1_i32_34 = arith.constant 1 : i32
    %49 = arith.addi %0, %c1_i32_34 : i32
    %c0_35 = arith.constant 0 : index
    %50 = arith.index_cast %49 : i32 to index
    %c2_36 = arith.constant 2 : index
    %c0_37 = arith.constant 0 : index
    %51 = vector.load %arg2[%c0_35, %50, %c2_36, %c0_37] : memref<1x18x18x8xf32, #tpu.memory_space<vmem>>, vector<1x8x16x8xf32>
    %52 = vector.shape_cast %51 : vector<1x8x16x8xf32> to vector<8x16x8xf32>
    %53 = vector.shape_cast %52 : vector<8x16x8xf32> to vector<128x8xf32>
    %c5 = arith.constant 5 : index
    %c0_38 = arith.constant 0 : index
    %c0_39 = arith.constant 0 : index
    %54 = vector.load %arg3[%c5, %c0_38, %c0_39] : memref<9x8x16xf32, #tpu.memory_space<vmem>>, vector<1x8x16xf32>
    %55 = vector.shape_cast %54 : vector<1x8x16xf32> to vector<8x16xf32>
    %cst_40 = arith.constant dense<0.000000e+00> : vector<128x16xf32>
    %56 = tpu.matmul %53, %55, %cst_40 {dimension_numbers = #tpu.dot_dimension_numbers<[1], [0], [0], [1], [0, 0, 1, 1], [], []>} : vector<128x8xf32>, vector<8x16xf32>, vector<128x16xf32> -> vector<128x16xf32>
    %57 = arith.addf %48, %56 : vector<128x16xf32>
    %c2_i32 = arith.constant 2 : i32
    %58 = arith.addi %0, %c2_i32 : i32
    %c0_41 = arith.constant 0 : index
    %59 = arith.index_cast %58 : i32 to index
    %c0_42 = arith.constant 0 : index
    %c0_43 = arith.constant 0 : index
    %60 = vector.load %arg2[%c0_41, %59, %c0_42, %c0_43] : memref<1x18x18x8xf32, #tpu.memory_space<vmem>>, vector<1x8x16x8xf32>
    %61 = vector.shape_cast %60 : vector<1x8x16x8xf32> to vector<8x16x8xf32>
    %62 = vector.shape_cast %61 : vector<8x16x8xf32> to vector<128x8xf32>
    %c6 = arith.constant 6 : index
    %c0_44 = arith.constant 0 : index
    %c0_45 = arith.constant 0 : index
    %63 = vector.load %arg3[%c6, %c0_44, %c0_45] : memref<9x8x16xf32, #tpu.memory_space<vmem>>, vector<1x8x16xf32>
    %64 = vector.shape_cast %63 : vector<1x8x16xf32> to vector<8x16xf32>
    %cst_46 = arith.constant dense<0.000000e+00> : vector<128x16xf32>
    %65 = tpu.matmul %62, %64, %cst_46 {dimension_numbers = #tpu.dot_dimension_numbers<[1], [0], [0], [1], [0, 0, 1, 1], [], []>} : vector<128x8xf32>, vector<8x16xf32>, vector<128x16xf32> -> vector<128x16xf32>
    %66 = arith.addf %57, %65 : vector<128x16xf32>
    %c2_i32_47 = arith.constant 2 : i32
    %67 = arith.addi %0, %c2_i32_47 : i32
    %c0_48 = arith.constant 0 : index
    %68 = arith.index_cast %67 : i32 to index
    %c1_49 = arith.constant 1 : index
    %c0_50 = arith.constant 0 : index
    %69 = vector.load %arg2[%c0_48, %68, %c1_49, %c0_50] : memref<1x18x18x8xf32, #tpu.memory_space<vmem>>, vector<1x8x16x8xf32>
    %70 = vector.shape_cast %69 : vector<1x8x16x8xf32> to vector<8x16x8xf32>
    %71 = vector.shape_cast %70 : vector<8x16x8xf32> to vector<128x8xf32>
    %c7 = arith.constant 7 : index
    %c0_51 = arith.constant 0 : index
    %c0_52 = arith.constant 0 : index
    %72 = vector.load %arg3[%c7, %c0_51, %c0_52] : memref<9x8x16xf32, #tpu.memory_space<vmem>>, vector<1x8x16xf32>
    %73 = vector.shape_cast %72 : vector<1x8x16xf32> to vector<8x16xf32>
    %cst_53 = arith.constant dense<0.000000e+00> : vector<128x16xf32>
    %74 = tpu.matmul %71, %73, %cst_53 {dimension_numbers = #tpu.dot_dimension_numbers<[1], [0], [0], [1], [0, 0, 1, 1], [], []>} : vector<128x8xf32>, vector<8x16xf32>, vector<128x16xf32> -> vector<128x16xf32>
    %75 = arith.addf %66, %74 : vector<128x16xf32>
    %c2_i32_54 = arith.constant 2 : i32
    %76 = arith.addi %0, %c2_i32_54 : i32
    %c0_55 = arith.constant 0 : index
    %77 = arith.index_cast %76 : i32 to index
    %c2_56 = arith.constant 2 : index
    %c0_57 = arith.constant 0 : index
    %78 = vector.load %arg2[%c0_55, %77, %c2_56, %c0_57] : memref<1x18x18x8xf32, #tpu.memory_space<vmem>>, vector<1x8x16x8xf32>
    %79 = vector.shape_cast %78 : vector<1x8x16x8xf32> to vector<8x16x8xf32>
    %80 = vector.shape_cast %79 : vector<8x16x8xf32> to vector<128x8xf32>
    %c8 = arith.constant 8 : index
    %c0_58 = arith.constant 0 : index
    %c0_59 = arith.constant 0 : index
    %81 = vector.load %arg3[%c8, %c0_58, %c0_59] : memref<9x8x16xf32, #tpu.memory_space<vmem>>, vector<1x8x16xf32>
    %82 = vector.shape_cast %81 : vector<1x8x16xf32> to vector<8x16xf32>
    %cst_60 = arith.constant dense<0.000000e+00> : vector<128x16xf32>
    %83 = tpu.matmul %80, %82, %cst_60 {dimension_numbers = #tpu.dot_dimension_numbers<[1], [0], [0], [1], [0, 0, 1, 1], [], []>} : vector<128x8xf32>, vector<8x16xf32>, vector<128x16xf32> -> vector<128x16xf32>
    %84 = arith.addf %75, %83 : vector<128x16xf32>
    %85 = vector.shape_cast %84 : vector<128x16xf32> to vector<1x8x16x16xf32>
    %c0_61 = arith.constant 0 : index
    %c0_62 = arith.constant 0 : index
    %c0_63 = arith.constant 0 : index
    %c0_64 = arith.constant 0 : index
    %86 = vector.load %arg5[%c0_61, %c0_62, %c0_63, %c0_64] : memref<1x8x16x16xf32, #tpu.memory_space<vmem>>, vector<1x8x16x16xf32>
    tpu.vector_store %arg5[%c0_61, %c0_62, %c0_63, %c0_64], %85 {strides = array<i32>} : memref<1x8x16x16xf32, #tpu.memory_space<vmem>>, vector<1x8x16x16xf32>,
    return
  }
  func.func @transform_0(%arg0: i32, %arg1: i32) -> (i32, i32, i32, i32) {
    %c0_i32 = arith.constant 0 : i32
    %c0_i32_0 = arith.constant 0 : i32
    %c0_i32_1 = arith.constant 0 : i32
    %c0_i32_2 = arith.constant 0 : i32
    return %arg0, %c0_i32, %c0_i32_0, %c0_i32_1 : i32, i32, i32, i32
  }
  func.func @transform_1(%arg0: i32, %arg1: i32) -> (i32, i32, i32) {
    %c0_i32 = arith.constant 0 : i32
    %c0_i32_0 = arith.constant 0 : i32
    %c0_i32_1 = arith.constant 0 : i32
    %c0_i32_2 = arith.constant 0 : i32
    return %c0_i32, %c0_i32_0, %c0_i32_1 : i32, i32, i32
  }
  func.func @transform_2(%arg0: i32, %arg1: i32) -> (i32, i32) {
    %c0_i32 = arith.constant 0 : i32
    %c0_i32_0 = arith.constant 0 : i32
    %c0_i32_1 = arith.constant 0 : i32
    return %c0_i32, %c0_i32_0 : i32, i32
  }
  func.func @transform_3(%arg0: i32, %arg1: i32) -> (i32, i32, i32, i32) {
    %c0_i32 = arith.constant 0 : i32
    %c0_i32_0 = arith.constant 0 : i32
    %c0_i32_1 = arith.constant 0 : i32
    return %arg0, %arg1, %c0_i32, %c0_i32_0 : i32, i32, i32, i32
  }
}

</mosaic_0001>

<bundles_post_ra>
// kernel: neg.1
= control target key start
LH: loop header
LB: loop body
LE: loop exit
PB: predicated region body
PF: predicated region fallthrough
CT: control target
= control target key end

     0   :  { %2 = vsyncpa [#allocation1], 0  ;;  %s124_s8 = smov [#allocation0]   ;;  %s125_s10 = smov 64   ;;  %s167_s0 = inlined_call_operand.hbm [shape: f32[9,4,8], index: 0, kind: input, shape index: {}]   ;;  %s168_s1 = inlined_call_operand.vmem [shape: f32[9,4,8], index: 1, kind: output, shape index: {}]  }
   0x1   :  { %s5_s0 = sshll.u32 %s167_s0, 4  ;;  %s7_s9 = sshll.u32 %s124_s8, 4  ;;  %s6_s0 = int_to_ptr.hbm [resolvable:$true] %s5_s0  ;;  %s8_s9 = int_to_ptr.vmem [resolvable:$true] %s7_s9 }
   0x2   :  { %s126_s11 = smov 4  }
   0x3   :  { %13 = dma.hbm_to_vmem [thread:$0]  %s6_s0, 576, %s8_s9, [#allocation1], %s125_s10, %s125_s10, %s126_s11  }
   0x4   :  { %122 = dma.done.wait [#allocation1], 576  }
   0x5   :  { %123 = vsyncadd [#allocation1], 4294966720  ;;  %v16_v0 = vld [vmem:[#allocation0] sm:$0xf]  ;;  %v23_v1 = vld [vmem:[#allocation0 + $0x4] sm:$0xf] }
   0x6   :  { %v31_v2 = vld [vmem:[#allocation0 + $0x8] sm:$0xf]  ;;  %v19_v3 = vxor.u32 2147483648, %v16_v0  ;;  %v26_v4 = vxor.u32 2147483648, %v23_v1  ;;  %v39_v6 = vld [vmem:[#allocation0 + $0xc] sm:$0xf] }
   0x7   :  { %v34_v5 = vxor.u32 2147483648, %v31_v2  ;;  %v42_v7 = vxor.u32 2147483648, %v39_v6  ;;  %v47_v8 = vld [vmem:[#allocation0 + $0x10] sm:$0xf]  ;;  %v55_v9 = vld [vmem:[#allocation0 + $0x14] sm:$0xf] }
   0x8   :  { %21 = vst [vmem:[%s168_s1] sm:$0xf] %v19_v3  ;;  %v50_v10 = vxor.u32 2147483648, %v47_v8  ;;  %v63_v11 = vld [vmem:[#allocation0 + $0x18] sm:$0xf]  ;;  %v58_v12 = vxor.u32 2147483648, %v55_v9 }
   0x9   :  { %87 = vst [vmem:[%s168_s1 + $0x4] sm:$0xf] %v26_v4  ;;  %v71_v13 = vld [vmem:[#allocation0 + $0x1c] sm:$0xf]  ;;  %v66_v14 = vxor.u32 2147483648, %v63_v11 }
   0xa   :  { %88 = vst [vmem:[%s168_s1 + $0x8] sm:$0xf] %v34_v5  ;;  %v79_v15 = vld [vmem:[#allocation0 + $0x20] sm:$0xf]  ;;  %v74_v16 = vxor.u32 2147483648, %v71_v13 }
   0xb   :  { %89 = vst [vmem:[%s168_s1 + $0xc] sm:$0xf] %v42_v7  ;;  %v82_v17 = vxor.u32 2147483648, %v79_v15 }
   0xc   :  { %90 = vst [vmem:[%s168_s1 + $0x10] sm:$0xf] %v50_v10 }
   0xd   :  { %91 = vst [vmem:[%s168_s1 + $0x14] sm:$0xf] %v58_v12 }
   0xe   :  { %92 = vst [vmem:[%s168_s1 + $0x18] sm:$0xf] %v66_v14 }
   0xf   :  { %93 = vst [vmem:[%s168_s1 + $0x1c] sm:$0xf] %v74_v16 }
  0x10   :  { %94 = vst [vmem:[%s168_s1 + $0x20] sm:$0xf] %v82_v17 }
  0x11   :  { %86 = vsyncpa [#allocation1], 1 }

// kernel: complex_conv2d.1
= control target key start
LH: loop header
LB: loop body
LE: loop exit
PB: predicated region body
PF: predicated region fallthrough
CT: control target
= control target key end

     0   :  { %s2020_s12 = smov 0   ;;  %s2022_s13 = smov 0   ;;  %s2655_s0 = inlined_call_operand.vmem [shape: f32[2,18,18,8], index: 0, kind: input, shape index: {}]   ;;  %s2656_s1 = inlined_call_operand.vmem [shape: f32[9,8,16], index: 1, kind: input, shape index: {}]   ;;  %s2657_s2 = inlined_call_operand.vmem [shape: f32[1,16], index: 2, kind: input, shape index: {}]   ;;  %s2658_s3 = inlined_call_operand.vmem [shape: f32[2,16,16,16], index: 3, kind: output, shape index: {}]  }
   0x1   :  { %s2024_s14 = smov 0   ;;  %s2026_s15 = smov 0  }
   0x2   :  { %s2028_s16 = smov 0  }
   0x3 LB: > { %s22_s17 = sadd.s32 1, %s1990_s14  ;;  %s25_s18 = sadd.s32 1, %s1994_s15  ;;  %s1998_s16 = sphi %s2028_s16, %s13_s16   ;;  %s1994_s15 = sphi %s2026_s15, %s2677_s15   ;;  %s1990_s14 = sphi %s2024_s14, %s2676_s14   ;;  %s1986_s13 = sphi %s2022_s13, %s2675_s13   ;;  %s1982_s12 = sphi %s2020_s12, %s2674_s12  }
   0x4   : > { %p23_p0 = scmp.ge.s32.totalorder %s22_s17, 2  ;;  %p1653_p1 = scmp.ge.s32.totalorder %s1998_s16, 1 }
   0x5   : > { %p151_p2 = scmp.lt.s32.totalorder %s1998_s16, 5 }
   0x6   : > { %s2679_s17 = smov (%p23_p0, %s22_s17), 0  ;;  %s2681_s18 = smov (!%p23_p0, %s25_s18), %s1994_s15 }
   0x7   : > { %p152_p3 = pnand %p1653_p1, %p151_p2  ;;  %p27_p4 = scmp.ge.s32.totalorder %s2681_s18, 2 }
   0x9   : > { %s2683_s18 = smov (%p27_p4, %s2681_s18), 0  ;;  %155 = sbr.rel (%p152_p3) target bundleno = 441 (0x1b9), region = 32 }
   0xe   : > { %v219_v0 = vld [vmem:[%s2656_s1] sm:$0xff]  ;;  %p180_p5 = scmp.lt.s32.totalorder %s1986_s13, 1  ;;  %v1694_v1 = vld [vmem:[%s2656_s1 + $0x10] sm:$0xff]  ;;  %v1729_v2 = vld [vmem:[%s2656_s1 + $0x18] sm:$0xff]  ;;  %s1660_s29 = smul.u32 192, %s1982_s12  ;;  %vm220_vm0 = vcmask 64512  }
   0xf   : > { %1915 = vmatpush.msra.mxu1 %v219_v0  ;;  %1916 = vmatpush.msra.mxu2 %v219_v0  ;;  %v1677_v3 = vld [vmem:[%s2656_s1 + $0x8] sm:$0xff]  ;;  %v1762_v4 = vld [vmem:[%s2656_s1 + $0x20] sm:$0xff]  ;;  %v1830_v10 = vld [vmem:[%s2656_s1 + $0x30] sm:$0xff]  ;;  %s1655_s25 = sshll.u32 %s1982_s12, 3  ;;  %vm1532_vm1 = vcmask 130048  }
  0x10   : > { %s2685_s13 = smov (!%p180_p5, %s1986_s13), 1  ;;  %1917 = vmatpush.msra.mxu3 %v219_v0  ;;  %284 = vmatpush.msra.mxu0 %v219_v0  ;;  %v1863_v12 = vld [vmem:[%s2656_s1 + $0x38] sm:$0xff]  ;;  %v1795_v13 = vld [vmem:[%s2656_s1 + $0x28] sm:$0xff]  ;;  %v1896_v16 = vld [vmem:[%s2656_s1 + $0x40] sm:$0xff]  ;;  %p188_p6 = scmp.lt.s32.totalorder %s1655_s25, 15 }
  0x11   : > { %578 = vmatpush.msrb.mxu2 %v1694_v1  ;;  %431 = vmatpush.msrb.mxu1 %v1677_v3  ;;  %s1918_s30 = smul.u32 432, %s2685_s13  ;;  %v2327_v55 = vld [vmem:[%s2657_s2] ss:$0 sm:$0xff]  ;;  %s1657_s26 = sshll.u32 %s2685_s13, 5 }
  0x12   : > { %728 = vmatpush.msrb.mxu3 %v1729_v2  ;;  %875 = vmatpush.msrb.mxu0 %v1762_v4  ;;  %s2687_s25 = smov (!%p188_p6, %s1655_s25), 15 }
  0x13   : > { %s184_s6 = scalar_lea.vmem %s2655_s0, %s1918_s30  ;;  %s1656_s12 = sshll.u32 %s2687_s25, 1 }
  0x14   : > { %s2074_s7 = scalar_lea.vmem %s184_s6, %s1660_s29  ;;  %s192_s27 = sadd.s32 %s1657_s26, %s1656_s12 }
  0x15   : > { %v2077_v5 = vld [vmem:[%s2074_s7 + $0x30] sm:$0xff]  ;;  %v2080_v6 = vld [vmem:[%s2074_s7 + $0x60] sm:$0xff]  ;;  %v2094_v9 = vld [vmem:[%s2074_s7 + $0x38] sm:$0xff]  ;;  %s1658_s28 = sshll.u32 %s192_s27, 3 }
  0x16   : > { %v2083_v7 = vld [vmem:[%s2074_s7 + $0x90] sm:$0xff]  ;;  %1665 = vmatmul.msk.f32.vlgmr.msra.gmra.mxu1 %vm220_vm0, %v2077_v5  ;;  %1669 = vmatmul.msk.f32.vlgmr.msra.gmra.mxu2 %vm220_vm0, %v2080_v6  ;;  %v203_v8 = vld [vmem:[%s2074_s7] sm:$0xff]  ;;  %v2100_v11 = vld [vmem:[%s2074_s7 + $0x68] sm:$0xff]  ;;  %s2591_s4 = scalar_lea.vmem %s2658_s3, %s1658_s28 }
  0x17   : > { %1673 = vmatmul.msk.f32.vlgmr.msra.gmra.mxu3 %vm220_vm0, %v2083_v7  ;;  %1661 = vmatmul.msk.f32.vlgmr.msra.gmra.mxu0 %vm220_vm0, %v203_v8  ;;  %v2109_v14 = vld [vmem:[%s2074_s7 + $0x98] sm:$0xff]  ;;  %v204_v15 = vld [vmem:[%s2074_s7 + $0x8] sm:$0xff]  ;;  %v2140_v21 = vld [vmem:[%s2074_s7 + $0x50] sm:$0xff] }
  0x18   : > { %1172 = vmatpush.msra.mxu2 %v1830_v10  ;;  %1319 = vmatpush.msra.mxu3 %v1863_v12  ;;  %v2123_v17 = vld [vmem:[%s2074_s7 + $0x48] sm:$0xff]  ;;  %v2126_v18 = vld [vmem:[%s2074_s7 + $0x78] sm:$0xff]  ;;  %v2143_v22 = vld [vmem:[%s2074_s7 + $0x80] sm:$0xff] }
  0x19   : > { %1022 = vmatpush.msra.mxu1 %v1795_v13  ;;  %1466 = vmatpush.msra.mxu0 %v1896_v16  ;;  %v2129_v19 = vld [vmem:[%s2074_s7 + $0xa8] sm:$0xff]  ;;  %v205_v20 = vld [vmem:[%s2074_s7 + $0x18] sm:$0xff]  ;;  %v2146_v23 = vld [vmem:[%s2074_s7 + $0xb0] sm:$0xff] }
  0x1a   : > { %v206_v24 = vld [vmem:[%s2074_s7 + $0x20] sm:$0xff]  ;;  %v351_v28 = vld [vmem:[%s2074_s7 + $0x9] sm:$0xff]  ;;  %v2174_v32 = vld [vmem:[%s2074_s7 + $0x31] sm:$0xff] }
  0x1b   : > { %v350_v25 = vld [vmem:[%s2074_s7 + $0x1] sm:$0xff]  ;;  %v1746_v27 = vld [vmem:[%s2074_s7 + $0x19] sm:$0xff]  ;;  %v498_v29 = vld [vmem:[%s2074_s7 + $0xa] sm:$0xff] }
  0x1c   : > { %v497_v26 = vld [vmem:[%s2074_s7 + $0x2] sm:$0xff]  ;;  %v2171_v31 = vld [vmem:[%s2074_s7 + $0x1a] sm:$0xff]  ;;  %v2197_v35 = vld [vmem:[%s2074_s7 + $0x32] sm:$0xff] }
  0x1d   : > { %v1747_v30 = vld [vmem:[%s2074_s7 + $0x21] sm:$0xff]  ;;  %v2187_v34 = vld [vmem:[%s2074_s7 + $0x39] sm:$0xff]  ;;  %v2200_v36 = vld [vmem:[%s2074_s7 + $0x49] sm:$0xff] }
  0x1e   : > { %1666 = vmatmul.msk.f32.gmra.mxu1 %vm220_vm0, %v2094_v9  ;;  %1670 = vmatmul.msk.f32.gmra.mxu2 %vm220_vm0, %v2100_v11  ;;  %v2184_v33 = vld [vmem:[%s2074_s7 + $0x22] sm:$0xff]  ;;  %v2211_v37 = vld [vmem:[%s2074_s7 + $0x3a] sm:$0xff]  ;;  %v2214_v38 = vld [vmem:[%s2074_s7 + $0x51] sm:$0xff] }
  0x1f   : > { %1674 = vmatmul.msk.f32.gmra.mxu3 %vm220_vm0, %v2109_v14  ;;  %1662 = vmatmul.msk.f32.gmra.mxu0 %vm220_vm0, %v204_v15  ;;  %v2225_v39 = vld [vmem:[%s2074_s7 + $0x4a] sm:$0xff]  ;;  %v2228_v40 = vld [vmem:[%s2074_s7 + $0x61] sm:$0xff]  ;;  %v2239_v41 = vld [vmem:[%s2074_s7 + $0x52] sm:$0xff] }
  0x20   : > { %v2242_v42 = vld [vmem:[%s2074_s7 + $0x69] sm:$0xff]  ;;  %v2256_v44 = vld [vmem:[%s2074_s7 + $0x79] sm:$0xff]  ;;  %v2270_v46 = vld [vmem:[%s2074_s7 + $0x81] sm:$0xff] }
  0x21   : > { %v2253_v43 = vld [vmem:[%s2074_s7 + $0x62] sm:$0xff]  ;;  %v2267_v45 = vld [vmem:[%s2074_s7 + $0x6a] sm:$0xff]  ;;  %v2281_v47 = vld [vmem:[%s2074_s7 + $0x7a] sm:$0xff] }
  0x22   : > { %v2284_v48 = vld [vmem:[%s2074_s7 + $0x91] sm:$0xff]  ;;  %v2295_v49 = vld [vmem:[%s2074_s7 + $0x82] sm:$0xff]  ;;  %v2298_v50 = vld [vmem:[%s2074_s7 + $0x99] sm:$0xff] }
  0x23   : > { %v2311_v52 = vld [vmem:[%s2074_s7 + $0x92] sm:$0xff]  ;;  %v2314_v54 = vld [vmem:[%s2074_s7 + $0xa9] sm:$0xff]  ;;  %v2338_v61 = vld [vmem:[%s2074_s7 + $0x9a] sm:$0xff] }
  0x24   : > { %v2341_v63 = vld [vmem:[%s2074_s7 + $0xb1] sm:$0xff]  ;;  %v2363_v10 = vld [vmem:[%s2074_s7 + $0xc0] sm:$0xff] }
  0x25   : > { %v2360_v8 = vld [vmem:[%s2074_s7 + $0xaa] sm:$0xff]  ;;  %v2366_v13 = vld [vmem:[%s2074_s7 + $0xc1] sm:$0xff] }
  0x26   : > { %1667 = vmatmul.msk.f32.gmra.mxu1 %vm220_vm0, %v2123_v17  ;;  %1671 = vmatmul.msk.f32.gmra.mxu2 %vm220_vm0, %v2126_v18  ;;  %2663 = vst [vmem:[#allocation3_spill] sm:$0xff] %v2366_v13 }
  0x27   : > { %1675 = vmatmul.msk.f32.gmra.mxu3 %vm220_vm0, %v2129_v19  ;;  %1663 = vmatmul.msk.f32.gmra.mxu0 %vm220_vm0, %v205_v20 }
  0x2e   : > { %1668 = vmatmul.msk.f32.gmra.mxu1 %vm220_vm0, %v2140_v21  ;;  %1672 = vmatmul.msk.f32.gmra.mxu2 %vm220_vm0, %v2143_v22 }
  0x2f   : > { %1676 = vmatmul.msk.f32.gmra.mxu3 %vm220_vm0, %v2146_v23  ;;  %1664 = vmatmul.msk.f32.gmra.mxu0 %vm220_vm0, %v206_v24 }
  0x36   : > { %1678 = vmatmul.msk.f32.vlgmr.msrb.gmra.mxu1 %vm220_vm0, %v350_v25  ;;  %1695 = vmatmul.msk.f32.vlgmr.msrb.gmra.mxu2 %vm220_vm0, %v497_v26  ;;  %v2385_v26 = vld [vmem:[%s2074_s7 + $0xb2] sm:$0xff] }
  0x37   : > { %1730 = vmatmul.msk.f32.vlgmr.msrb.gmra.mxu3 %vm220_vm0, %v205_v20  ;;  %1763 = vmatmul.msk.f32.vlgmr.msrb.gmra.mxu0 %vm220_vm0, %v1746_v27 }
  0x3e   : > { %1679 = vmatmul.msk.f32.gmra.mxu1 %vm220_vm0, %v351_v28  ;;  %1696 = vmatmul.msk.f32.gmra.mxu2 %vm220_vm0, %v498_v29  ;;  %v2391_v29 = vld [vmem:[%s2074_s7 + $0xc9] sm:$0xff] }
  0x3f   : > { %1731 = vmatmul.msk.f32.gmra.mxu3 %vm220_vm0, %v206_v24  ;;  %1764 = vmatmul.msk.f32.gmra.mxu0 %vm220_vm0, %v1747_v30  ;;  %2666 = vst [vmem:[#allocation6_spill] sm:$0xff] %v2391_v29 }
  0x46   : > { %1680 = vmatmul.msk.f32.gmra.mxu1 %vm220_vm0, %v1746_v27  ;;  %1697 = vmatmul.msk.f32.gmra.mxu2 %vm220_vm0, %v2171_v31  ;;  %v2388_v27 = vld [vmem:[%s2074_s7 + $0xc8] sm:$0xff] }
  0x47   : > { %1732 = vmatmul.msk.f32.gmra.mxu3 %vm220_vm0, %v2077_v5  ;;  %1765 = vmatmul.msk.f32.gmra.mxu0 %vm220_vm0, %v2174_v32  ;;  %2665 = vst [vmem:[#allocation5_spill] sm:$0xff] %v2388_v27 }
  0x4e   : > { %1681 = vmatmul.msk.f32.gmra.mxu1 %vm220_vm0, %v1747_v30  ;;  %1698 = vmatmul.msk.f32.gmra.mxu2 %vm220_vm0, %v2184_v33 }
  0x4f   : > { %1733 = vmatmul.msk.f32.gmra.mxu3 %vm220_vm0, %v2094_v9  ;;  %1766 = vmatmul.msk.f32.gmra.mxu0 %vm220_vm0, %v2187_v34 }
  0x56   : > { %1682 = vmatmul.msk.f32.gmra.mxu1 %vm220_vm0, %v2174_v32  ;;  %1699 = vmatmul.msk.f32.gmra.mxu2 %vm220_vm0, %v2197_v35 }
  0x57   : > { %1734 = vmatmul.msk.f32.gmra.mxu3 %vm220_vm0, %v2123_v17  ;;  %1767 = vmatmul.msk.f32.gmra.mxu0 %vm220_vm0, %v2200_v36 }
  0x5e   : > { %1683 = vmatmul.msk.f32.gmra.mxu1 %vm220_vm0, %v2187_v34  ;;  %1700 = vmatmul.msk.f32.gmra.mxu2 %vm220_vm0, %v2211_v37 }
  0x5f   : > { %1735 = vmatmul.msk.f32.gmra.mxu3 %vm220_vm0, %v2140_v21  ;;  %1768 = vmatmul.msk.f32.gmra.mxu0 %vm220_vm0, %v2214_v38 }
  0x66   : > { %1684 = vmatmul.msk.f32.gmra.mxu1 %vm220_vm0, %v2200_v36  ;;  %1701 = vmatmul.msk.f32.gmra.mxu2 %vm220_vm0, %v2225_v39 }
  0x67   : > { %1736 = vmatmul.msk.f32.gmra.mxu3 %vm220_vm0, %v2080_v6  ;;  %1769 = vmatmul.msk.f32.gmra.mxu0 %vm220_vm0, %v2228_v40 }
  0x6e   : > { %1685 = vmatmul.msk.f32.gmra.mxu1 %vm220_vm0, %v2214_v38  ;;  %1702 = vmatmul.msk.f32.gmra.mxu2 %vm220_vm0, %v2239_v41 }
  0x6f   : > { %1737 = vmatmul.msk.f32.gmra.mxu3 %vm220_vm0, %v2100_v11  ;;  %1770 = vmatmul.msk.f32.gmra.mxu0 %vm220_vm0, %v2242_v42 }
  0x76   : > { %1686 = vmatmul.msk.f32.gmra.mxu1 %vm220_vm0, %v2228_v40  ;;  %1703 = vmatmul.msk.f32.gmra.mxu2 %vm220_vm0, %v2253_v43 }
  0x77   : > { %1738 = vmatmul.msk.f32.gmra.mxu3 %vm220_vm0, %v2126_v18  ;;  %1771 = vmatmul.msk.f32.gmra.mxu0 %vm220_vm0, %v2256_v44 }
  0x7e   : > { %1687 = vmatmul.msk.f32.gmra.mxu1 %vm220_vm0, %v2242_v42  ;;  %1704 = vmatmul.msk.f32.gmra.mxu2 %vm220_vm0, %v2267_v45 }
  0x7f   : > { %1739 = vmatmul.msk.f32.gmra.mxu3 %vm220_vm0, %v2143_v22  ;;  %1772 = vmatmul.msk.f32.gmra.mxu0 %vm220_vm0, %v2270_v46 }
  0x86   : > { %1688 = vmatmul.msk.f32.gmra.mxu1 %vm220_vm0, %v2256_v44  ;;  %1705 = vmatmul.msk.f32.gmra.mxu2 %vm220_vm0, %v2281_v47 }
  0x87   : > { %1740 = vmatmul.msk.f32.gmra.mxu3 %vm220_vm0, %v2083_v7  ;;  %1773 = vmatmul.msk.f32.gmra.mxu0 %vm220_vm0, %v2284_v48 }
  0x8e   : > { %1689 = vmatmul.msk.f32.gmra.mxu1 %vm220_vm0, %v2270_v46  ;;  %1706 = vmatmul.msk.f32.gmra.mxu2 %vm220_vm0, %v2295_v49 }
  0x8f   : > { %1741 = vmatmul.msk.f32.gmra.mxu3 %vm220_vm0, %v2109_v14  ;;  %1774 = vmatmul.msk.f32.gmra.mxu0 %vm220_vm0, %v2298_v50 }
  0x93   : > { %v2308_v51 = vpop.f32.mrf.mxu1 }
  0x94   : > { %v286_v53 = vpop.f32.mrf.mxu0 }
  0x96   : > { %1690 = vmatmul.msk.f32.gmra.mxu1 %vm220_vm0, %v2284_v48  ;;  %1707 = vmatmul.msk.f32.gmra.mxu2 %vm220_vm0, %v2311_v52 }
  0x97   : > { %1742 = vmatmul.msk.f32.gmra.mxu3 %vm220_vm0, %v2129_v19  ;;  %1775 = vmatmul.msk.f32.gmra.mxu0 %vm220_vm0, %v2314_v54 }
  0x99   : > { %v310_v56 = vpop.f32.mrf.mxu2 }
  0x9a   : > { %v2330_v57 = vadd.f32 %v2327_v55, %v310_v56  ;;  %v322_v58 = vpop.f32.mrf.mxu3 }
  0x9b   : > { %v2332_v59 = vpop.f32.mrf.mxu1  ;;  %v2335_v60 = vadd.f32 %v2327_v55, %v322_v58 }
  0x9c   : > { %v289_v62 = vpop.f32.mrf.mxu0 }
  0x9e   : > { %1691 = vmatmul.msk.f32.gmra.mxu1 %vm220_vm0, %v2298_v50  ;;  %1708 = vmatmul.msk.f32.gmra.mxu2 %vm220_vm0, %v2338_v61 }
  0x9f   : > { %1743 = vmatmul.msk.f32.gmra.mxu3 %vm220_vm0, %v2146_v23  ;;  %1776 = vmatmul.msk.f32.gmra.mxu0 %vm220_vm0, %v2341_v63 }
  0xa1   : > { %v313_v0 = vpop.f32.mrf.mxu2 }
  0xa2   : > { %v2352_v1 = vadd.f32 %v2327_v55, %v313_v0  ;;  %v325_v2 = vpop.f32.mrf.mxu3 }
  0xa3   : > { %v2354_v3 = vpop.f32.mrf.mxu1  ;;  %v2357_v4 = vadd.f32 %v2327_v55, %v325_v2 }
  0xa4   : > { %v292_v12 = vpop.f32.mrf.mxu0 }
  0xa5   : > { %2662 = vst [vmem:[#allocation2_spill] sm:$0xff] %v2357_v4 }
  0xa6   : > { %1692 = vmatmul.msk.f32.gmra.mxu1 %vm220_vm0, %v2314_v54  ;;  %1709 = vmatmul.msk.f32.gmra.mxu2 %vm220_vm0, %v2360_v8 }
  0xa7   : > { %1744 = vmatmul.msk.f32.gmra.mxu3 %vm220_vm0, %v2363_v10  ;;  %1777 = vmatmul.msk.f32.gmra.mxu0 %vm220_vm0, %v2366_v13 }
  0xa9   : > { %v316_v15 = vpop.f32.mrf.mxu2 }
  0xaa   : > { %v2377_v16 = vadd.f32 %v2327_v55, %v316_v15  ;;  %v328_v20 = vpop.f32.mrf.mxu3 }
  0xab   : > { %v2379_v24 = vpop.f32.mrf.mxu1  ;;  %v2382_v25 = vadd.f32 %v2327_v55, %v328_v20  ;;  %v334_v20 = vadd.f32 %v2327_v55, %v286_v53  ;;  %v335_v53 = vadd.f32 %v2327_v55, %v289_v62 }
  0xac   : > { %v295_v28 = vpop.f32.mrf.mxu0 }
  0xad   : > { %2664 = vst [vmem:[#allocation4_spill] sm:$0xff] %v2382_v25 }
  0xae   : > { %1693 = vmatmul.msk.f32.gmra.mxu1 %vm220_vm0, %v2341_v63  ;;  %1710 = vmatmul.msk.f32.gmra.mxu2 %vm220_vm0, %v2385_v26 }
  0xaf   : > { %1745 = vmatmul.msk.f32.gmra.mxu3 %vm220_vm0, %v2388_v27  ;;  %1778 = vmatmul.msk.f32.gmra.mxu0 %vm220_vm0, %v2391_v29 }
  0xb1   : > { %v319_v30 = vpop.f32.mrf.mxu2 }
  0xb2   : > { %v2402_v56 = vadd.f32 %v2327_v55, %v319_v30  ;;  %v331_v58 = vpop.f32.mrf.mxu3 }
  0xb3   : > { %v2405_v0 = vadd.f32 %v2327_v55, %v331_v58  ;;  %v433_v2 = vpop.f32.mrf.mxu1 }
  0xb4   : > { %v877_v15 = vpop.f32.mrf.mxu0  ;;  %v481_v30 = vadd.f32 %v433_v2, %v334_v20  ;;  %v336_v2 = vadd.f32 %v2327_v55, %v292_v12 }
  0xb5   : > { %2667 = vst [vmem:[#allocation7_spill] sm:$0xff] %v2405_v0 }
  0xb6   : > { %1796 = vmatmul.msk.f32.vlgmr.msra.gmra.mxu1 %vm220_vm0, %v2171_v31  ;;  %1831 = vmatmul.msk.f32.vlgmr.msra.gmra.mxu2 %vm220_vm0, %v2077_v5 }
  0xb7   : > { %1864 = vmatmul.msk.f32.vlgmr.msra.gmra.mxu3 %vm220_vm0, %v2174_v32  ;;  %1897 = vmatmul.msk.f32.vlgmr.msra.gmra.mxu0 %vm220_vm0, %v2197_v35 }
  0xb9   : > { %v580_v25 = vpop.f32.mrf.mxu2 }
  0xba   : > { %v628_v58 = vadd.f32 %v580_v25, %v481_v30  ;;  %v730_v0 = vpop.f32.mrf.mxu3  ;;  %v337_v30 = vadd.f32 %v2327_v55, %v295_v28 }
  0xbb   : > { %v436_v29 = vpop.f32.mrf.mxu1 }
  0xbc   : > { %v778_v27 = vadd.f32 %v730_v0, %v628_v58  ;;  %v880_v4 = vpop.f32.mrf.mxu0  ;;  %v482_v5 = vadd.f32 %v436_v29, %v335_v53 }
  0xbe   : > { %v2417_v13 = vadd.f32 %v877_v15, %v778_v27  ;;  %1797 = vmatmul.msk.f32.gmra.mxu1 %vm220_vm0, %v2184_v33  ;;  %1832 = vmatmul.msk.f32.gmra.mxu2 %vm220_vm0, %v2094_v9 }
  0xbf   : > { %1865 = vmatmul.msk.f32.gmra.mxu3 %vm220_vm0, %v2187_v34  ;;  %1898 = vmatmul.msk.f32.gmra.mxu0 %vm220_vm0, %v2211_v37 }
  0xc1   : > { %v583_v31 = vpop.f32.mrf.mxu2 }
  0xc2   : > { %v629_v32 = vadd.f32 %v583_v31, %v482_v5  ;;  %v733_v25 = vpop.f32.mrf.mxu3 }
  0xc3   : > { %v439_v0 = vpop.f32.mrf.mxu1 }
  0xc4   : > { %v779_v62 = vadd.f32 %v733_v25, %v629_v32  ;;  %v883_v27 = vpop.f32.mrf.mxu0  ;;  %v483_v9 = vadd.f32 %v439_v0, %v336_v2  ;;  %v338_v32 = vadd.f32 %v2327_v55, %v2308_v51  ;;  %v339_v2 = vadd.f32 %v2327_v55, %v2332_v59 }
  0xc6   : > { %v2428_v15 = vadd.f32 %v880_v4, %v779_v62  ;;  %1798 = vmatmul.msk.f32.gmra.mxu1 %vm220_vm0, %v2197_v35  ;;  %1833 = vmatmul.msk.f32.gmra.mxu2 %vm220_vm0, %v2123_v17 }
  0xc7   : > { %1866 = vmatmul.msk.f32.gmra.mxu3 %vm220_vm0, %v2200_v36  ;;  %1899 = vmatmul.msk.f32.gmra.mxu0 %vm220_vm0, %v2225_v39 }
  0xc9   : > { %v586_v33 = vpop.f32.mrf.mxu2 }
  0xca   : > { %v630_v34 = vadd.f32 %v586_v33, %v483_v9  ;;  %v736_v29 = vpop.f32.mrf.mxu3 }
  0xcb   : > { %v442_v20 = vpop.f32.mrf.mxu1 }
  0xcc   : > { %v780_v12 = vadd.f32 %v736_v29, %v630_v34  ;;  %v886_v4 = vpop.f32.mrf.mxu0  ;;  %v484_v17 = vadd.f32 %v442_v20, %v337_v30  ;;  %v340_v20 = vadd.f32 %v2327_v55, %v2354_v3 }
  0xce   : > { %v2439_v58 = vadd.f32 %v883_v27, %v780_v12  ;;  %1799 = vmatmul.msk.f32.gmra.mxu1 %vm220_vm0, %v2211_v37  ;;  %1834 = vmatmul.msk.f32.gmra.mxu2 %vm220_vm0, %v2140_v21 }
  0xcf   : > { %1867 = vmatmul.msk.f32.gmra.mxu3 %vm220_vm0, %v2214_v38  ;;  %1900 = vmatmul.msk.f32.gmra.mxu0 %vm220_vm0, %v2239_v41 }
  0xd1   : > { %v589_v35 = vpop.f32.mrf.mxu2 }
  0xd2   : > { %v631_v36 = vadd.f32 %v589_v35, %v484_v17  ;;  %v739_v53 = vpop.f32.mrf.mxu3  ;;  %v341_v35 = vadd.f32 %v2327_v55, %v2379_v24 }
  0xd3   : > { %v445_v5 = vpop.f32.mrf.mxu1 }
  0xd4   : > { %v781_v28 = vadd.f32 %v739_v53, %v631_v36  ;;  %v889_v31 = vpop.f32.mrf.mxu0  ;;  %v485_v21 = vadd.f32 %v445_v5, %v338_v32 }
  0xd6   : > { %v2451_v37 = vadd.f32 %v886_v4, %v781_v28  ;;  %1800 = vmatmul.msk.f32.gmra.mxu1 %vm220_vm0, %v2225_v39  ;;  %1835 = vmatmul.msk.f32.gmra.mxu2 %vm220_vm0, %v2080_v6 }
  0xd7   : > { %1868 = vmatmul.msk.f32.gmra.mxu3 %vm220_vm0, %v2228_v40  ;;  %1901 = vmatmul.msk.f32.gmra.mxu0 %vm220_vm0, %v2253_v43 }
  0xd9   : > { %v592_v38 = vpop.f32.mrf.mxu2 }
  0xda   : > { %v632_v25 = vadd.f32 %v592_v38, %v485_v21  ;;  %v742_v0 = vpop.f32.mrf.mxu3 }
  0xdb   : > { %v448_v62 = vpop.f32.mrf.mxu1 }
  0xdc   : > { %v782_v51 = vadd.f32 %v742_v0, %v632_v25  ;;  %v892_v27 = vpop.f32.mrf.mxu0  ;;  %v486_v6 = vadd.f32 %v448_v62, %v339_v2 }
  0xde   : > { %v2463_v39 = vadd.f32 %v889_v31, %v782_v51  ;;  %1801 = vmatmul.msk.f32.gmra.mxu1 %vm220_vm0, %v2239_v41  ;;  %1836 = vmatmul.msk.f32.gmra.mxu2 %vm220_vm0, %v2100_v11 }
  0xdf   : > { %1869 = vmatmul.msk.f32.gmra.mxu3 %vm220_vm0, %v2242_v42  ;;  %1902 = vmatmul.msk.f32.gmra.mxu0 %vm220_vm0, %v2267_v45 }
  0xe1   : > { %v595_v40 = vpop.f32.mrf.mxu2 }
  0xe2   : > { %v633_v9 = vadd.f32 %v595_v40, %v486_v6  ;;  %v745_v33 = vpop.f32.mrf.mxu3 }
  0xe3   : > { %v451_v34 = vpop.f32.mrf.mxu1 }
  0xe4   : > { %v783_v59 = vadd.f32 %v745_v33, %v633_v9  ;;  %v895_v29 = vpop.f32.mrf.mxu0  ;;  %v487_v11 = vadd.f32 %v451_v34, %v340_v20 }
  0xe6   : > { %v2475_v41 = vadd.f32 %v892_v27, %v783_v59  ;;  %1802 = vmatmul.msk.f32.gmra.mxu1 %vm220_vm0, %v2253_v43  ;;  %1837 = vmatmul.msk.f32.gmra.mxu2 %vm220_vm0, %v2126_v18 }
  0xe7   : > { %1870 = vmatmul.msk.f32.gmra.mxu3 %vm220_vm0, %v2256_v44  ;;  %1903 = vmatmul.msk.f32.gmra.mxu0 %vm220_vm0, %v2281_v47 }
  0xe9   : > { %v598_v42 = vpop.f32.mrf.mxu2 }
  0xea   : > { %v634_v12 = vadd.f32 %v598_v42, %v487_v11  ;;  %v748_v4 = vpop.f32.mrf.mxu3  ;;  %v2669_v42 = vld [vmem:[#allocation2_spill] sm:$0xff] }
  0xeb   : > { %v454_v30 = vpop.f32.mrf.mxu1 }
  0xec   : > { %v784_v3 = vadd.f32 %v748_v4, %v634_v12  ;;  %v898_v17 = vpop.f32.mrf.mxu0  ;;  %v488_v18 = vadd.f32 %v454_v30, %v341_v35 }
  0xee   : > { %v2487_v43 = vadd.f32 %v895_v29, %v784_v3  ;;  %1803 = vmatmul.msk.f32.gmra.mxu1 %vm220_vm0, %v2267_v45  ;;  %1838 = vmatmul.msk.f32.gmra.mxu2 %vm220_vm0, %v2143_v22  ;;  %v1892_v29 = vld [vmem:[%s2074_s7 + $0xc2] sm:$0xff] }
  0xef   : > { %1871 = vmatmul.msk.f32.gmra.mxu3 %vm220_vm0, %v2270_v46  ;;  %1904 = vmatmul.msk.f32.gmra.mxu0 %vm220_vm0, %v2295_v49 }
  0xf1   : > { %v601_v44 = vpop.f32.mrf.mxu2 }
  0xf2   : > { %v635_v36 = vadd.f32 %v601_v44, %v488_v18  ;;  %v751_v53 = vpop.f32.mrf.mxu3 }
  0xf3   : > { %v457_v5 = vpop.f32.mrf.mxu1 }
  0xf4   : > { %v489_v55 = vadd.f32 %v457_v5, %v2330_v57  ;;  %v785_v24 = vadd.f32 %v751_v53, %v635_v36  ;;  %v901_v28 = vpop.f32.mrf.mxu0  ;;  %v1828_v53 = vld [vmem:[%s2074_s7 + $0xd8] sm:$0xff]  ;;  %v2672_v5 = vld [vmem:[#allocation4_spill] sm:$0xff] }
  0xf6   : > { %v2498_v31 = vadd.f32 %v898_v17, %v785_v24  ;;  %1804 = vmatmul.msk.f32.gmra.mxu1 %vm220_vm0, %v2281_v47  ;;  %1839 = vmatmul.msk.f32.gmra.mxu2 %vm220_vm0, %v2083_v7  ;;  %v2671_v17 = vld [vmem:[#allocation6_spill] sm:$0xff] }
  0xf7   : > { %1872 = vmatmul.msk.f32.gmra.mxu3 %vm220_vm0, %v2284_v48  ;;  %1905 = vmatmul.msk.f32.gmra.mxu0 %vm220_vm0, %v2311_v52 }
  0xf9   : > { %v604_v22 = vpop.f32.mrf.mxu2 }
  0xfa   : > { %v636_v45 = vadd.f32 %v604_v22, %v489_v55  ;;  %v754_v46 = vpop.f32.mrf.mxu3  ;;  %v1894_v22 = vld [vmem:[%s2074_s7 + $0xda] sm:$0xff] }
  0xfb   : > { %v460_v57 = vpop.f32.mrf.mxu1 }
  0xfc   : > { %v490_v32 = vadd.f32 %v460_v57, %v2352_v1  ;;  %v786_v21 = vadd.f32 %v754_v46, %v636_v45  ;;  %v904_v38 = vpop.f32.mrf.mxu0 }
  0xfe   : > { %v2509_v25 = vadd.f32 %v901_v28, %v786_v21  ;;  %1805 = vmatmul.msk.f32.gmra.mxu1 %vm220_vm0, %v2295_v49  ;;  %1840 = vmatmul.msk.f32.gmra.mxu2 %vm220_vm0, %v2109_v14  ;;  %v1861_v28 = vld [vmem:[%s2074_s7 + $0xd9] sm:$0xff] }
  0xff   : > { %1873 = vmatmul.msk.f32.gmra.mxu3 %vm220_vm0, %v2298_v50  ;;  %1906 = vmatmul.msk.f32.gmra.mxu0 %vm220_vm0, %v2338_v61 }
 0x101   : > { %v607_v7 = vpop.f32.mrf.mxu2 }
 0x102   : > { %v637_v47 = vadd.f32 %v607_v7, %v490_v32  ;;  %v757_v48 = vpop.f32.mrf.mxu3  ;;  %v2673_v7 = vld [vmem:[#allocation7_spill] sm:$0xff] }
 0x103   : > { %v463_v1 = vpop.f32.mrf.mxu1 }
 0x104   : > { %v491_v0 = vadd.f32 %v463_v1, %v2377_v16  ;;  %v787_v62 = vadd.f32 %v757_v48, %v637_v47  ;;  %v907_v51 = vpop.f32.mrf.mxu0  ;;  %v1862_v1 = vld [vmem:[%s2074_s7 + $0xe1] sm:$0xff] }
 0x106   : > { %v2520_v27 = vadd.f32 %v904_v38, %v787_v62  ;;  %1806 = vmatmul.msk.f32.gmra.mxu1 %vm220_vm0, %v2311_v52  ;;  %1841 = vmatmul.msk.f32.gmra.mxu2 %vm220_vm0, %v2129_v19  ;;  %v1829_v38 = vld [vmem:[%s2074_s7 + $0xe0] sm:$0xff] }
 0x107   : > { %1874 = vmatmul.msk.f32.gmra.mxu3 %vm220_vm0, %v2314_v54  ;;  %1907 = vmatmul.msk.f32.gmra.mxu0 %vm220_vm0, %v2360_v8  ;;  %v1895_v62 = vld [vmem:[%s2074_s7 + $0xe2] sm:$0xff] }
 0x109   : > { %v610_v14 = vpop.f32.mrf.mxu2 }
 0x10a   : > { %v638_v49 = vadd.f32 %v610_v14, %v491_v0  ;;  %v760_v50 = vpop.f32.mrf.mxu3 }
 0x10b   : > { %v466_v16 = vpop.f32.mrf.mxu1 }
 0x10c   : > { %v492_v2 = vadd.f32 %v466_v16, %v2402_v56  ;;  %v788_v6 = vadd.f32 %v760_v50, %v638_v49  ;;  %v910_v40 = vpop.f32.mrf.mxu0 }
 0x10e   : > { %v2531_v9 = vadd.f32 %v907_v51, %v788_v6  ;;  %1807 = vmatmul.msk.f32.gmra.mxu1 %vm220_vm0, %v2338_v61  ;;  %1842 = vmatmul.msk.f32.gmra.mxu2 %vm220_vm0, %v2146_v23  ;;  %v2668_v23 = vld [vmem:[#allocation3_spill] sm:$0xff] }
 0x10f   : > { %1875 = vmatmul.msk.f32.gmra.mxu3 %vm220_vm0, %v2341_v63  ;;  %1908 = vmatmul.msk.f32.gmra.mxu0 %vm220_vm0, %v2385_v26 }
 0x111   : > { %v613_v19 = vpop.f32.mrf.mxu2 }
 0x112   : > { %v639_v52 = vadd.f32 %v613_v19, %v492_v2  ;;  %v763_v54 = vpop.f32.mrf.mxu3 }
 0x113   : > { %v469_v56 = vpop.f32.mrf.mxu1 }
 0x114   : > { %v493_v33 = vadd.f32 %v469_v56, %v2335_v60  ;;  %v789_v34 = vadd.f32 %v763_v54, %v639_v52  ;;  %v913_v59 = vpop.f32.mrf.mxu0 }
 0x116   : > { %v2543_v61 = vadd.f32 %v910_v40, %v789_v34  ;;  %1808 = vmatmul.msk.f32.gmra.mxu1 %vm220_vm0, %v2360_v8  ;;  %1843 = vmatmul.msk.f32.gmra.mxu2 %vm220_vm0, %v2363_v10  ;;  %v1893_v8 = vld [vmem:[%s2074_s7 + $0xca] sm:$0xff]  ;;  %v2670_v10 = vld [vmem:[#allocation5_spill] sm:$0xff] }
 0x117   : > { %1876 = vmatmul.msk.f32.gmra.mxu3 %vm220_vm0, %v2668_v23  ;;  %1909 = vmatmul.msk.f32.gmra.mxu0 %vm220_vm0, %v1892_v29 }
 0x119   : > { %v616_v63 = vpop.f32.mrf.mxu2 }
 0x11a   : > { %v640_v20 = vadd.f32 %v616_v63, %v493_v33  ;;  %v766_v60 = vpop.f32.mrf.mxu3 }
 0x11b   : > { %v472_v11 = vpop.f32.mrf.mxu1 }
 0x11c   : > { %v494_v12 = vadd.f32 %v472_v11, %v2669_v42  ;;  %v790_v4 = vadd.f32 %v766_v60, %v640_v20  ;;  %v916_v30 = vpop.f32.mrf.mxu0 }
 0x11e   : > { %v2554_v3 = vadd.f32 %v913_v59, %v790_v4  ;;  %1809 = vmatmul.msk.f32.gmra.mxu1 %vm220_vm0, %v2385_v26  ;;  %1844 = vmatmul.msk.f32.gmra.mxu2 %vm220_vm0, %v2670_v10 }
 0x11f   : > { %1877 = vmatmul.msk.f32.gmra.mxu3 %vm220_vm0, %v2671_v17  ;;  %1910 = vmatmul.msk.f32.gmra.mxu0 %vm220_vm0, %v1893_v8 }
 0x121   : > { %v619_v35 = vpop.f32.mrf.mxu2 }
 0x122   : > { %v641_v18 = vadd.f32 %v619_v35, %v494_v12  ;;  %v769_v44 = vpop.f32.mrf.mxu3 }
 0x123   : > { %v475_v36 = vpop.f32.mrf.mxu1 }
 0x124   : > { %v495_v55 = vadd.f32 %v475_v36, %v2672_v5  ;;  %v791_v24 = vadd.f32 %v769_v44, %v641_v18  ;;  %v919_v26 = vpop.f32.mrf.mxu0 }
 0x126   : > { %v2567_v45 = vadd.f32 %v916_v30, %v791_v24  ;;  %1810 = vmatmul.msk.f32.gmra.mxu1 %vm220_vm0, %v1892_v29  ;;  %1845 = vmatmul.msk.f32.gmra.mxu2 %vm220_vm0, %v1828_v53 }
 0x127   : > { %1878 = vmatmul.msk.f32.gmra.mxu3 %vm220_vm0, %v1861_v28  ;;  %1911 = vmatmul.msk.f32.gmra.mxu0 %vm220_vm0, %v1894_v22 }
 0x129   : > { %v622_v46 = vpop.f32.mrf.mxu2 }
 0x12a   : > { %v642_v57 = vadd.f32 %v622_v46, %v495_v55  ;;  %v772_v32 = vpop.f32.mrf.mxu3 }
 0x12b   : > { %v478_v21 = vpop.f32.mrf.mxu1 }
 0x12c   : > { %v496_v47 = vadd.f32 %v478_v21, %v2673_v7  ;;  %v792_v48 = vadd.f32 %v772_v32, %v642_v57  ;;  %v922_v0 = vpop.f32.mrf.mxu0 }
 0x12e   : > { %v2578_v51 = vadd.f32 %v919_v26, %v792_v48  ;;  %1811 = vmatmul.msk.f32.gmra.mxu1 %vm220_vm0, %v1893_v8  ;;  %1846 = vmatmul.msk.f32.gmra.mxu2 %vm220_vm0, %v1829_v38 }
 0x12f   : > { %1879 = vmatmul.msk.f32.gmra.mxu3 %vm220_vm0, %v1862_v1  ;;  %1912 = vmatmul.msk.f32.gmra.mxu0 %vm220_vm0, %v1895_v62 }
 0x131   : > { %v625_v14 = vpop.f32.mrf.mxu2 }
 0x132   : > { %v643_v49 = vadd.f32 %v625_v14, %v496_v47  ;;  %v775_v50 = vpop.f32.mrf.mxu3 }
 0x133   : > { %v1024_v16 = vpop.f32.mrf.mxu1 }
 0x134   : > { %v793_v2 = vadd.f32 %v775_v50, %v643_v49  ;;  %v1468_v6 = vpop.f32.mrf.mxu0  ;;  %v1072_v19 = vadd.f32 %v1024_v16, %v2417_v13 }
 0x136   : > { %v2585_v40 = vadd.f32 %v922_v0, %v793_v2 }
 0x139   : > { %v1174_v52 = vpop.f32.mrf.mxu2 }
 0x13a   : > { %v1222_v54 = vadd.f32 %v1174_v52, %v1072_v19  ;;  %v1321_v56 = vpop.f32.mrf.mxu3 }
 0x13b   : > { %v1027_v33 = vpop.f32.mrf.mxu1 }
 0x13c   : > { %v1369_v34 = vadd.f32 %v1321_v56, %v1222_v54  ;;  %v1471_v59 = vpop.f32.mrf.mxu0  ;;  %v1073_v23 = vadd.f32 %v1027_v33, %v2428_v15 }
 0x13e   : > { %v1516_v29 = vadd.f32 %v1468_v6, %v1369_v34 }
 0x140   : > { %1533 = vst.msk [vmem:[%s2591_s4] sm:$0xff] %vm1532_vm1, %v1516_v29 }
 0x141   : > { %v1177_v13 = vpop.f32.mrf.mxu2 }
 0x142   : > { %v1223_v63 = vadd.f32 %v1177_v13, %v1073_v23  ;;  %v1324_v20 = vpop.f32.mrf.mxu3 }
 0x143   : > { %v1030_v60 = vpop.f32.mrf.mxu1 }
 0x144   : > { %v1370_v11 = vadd.f32 %v1324_v20, %v1223_v63  ;;  %v1474_v42 = vpop.f32.mrf.mxu0  ;;  %v1074_v4 = vadd.f32 %v1030_v60, %v2439_v58 }
 0x146   : > { %v1517_v12 = vadd.f32 %v1471_v59, %v1370_v11 }
 0x148   : > { %1534 = vst.msk [vmem:[%s2591_s4 + $0x8] sm:$0xff] %vm1532_vm1, %v1517_v12 }
 0x149   : > { %v1180_v30 = vpop.f32.mrf.mxu2 }
 0x14a   : > { %v1224_v8 = vadd.f32 %v1180_v30, %v1074_v4  ;;  %v1327_v10 = vpop.f32.mrf.mxu3 }
 0x14b   : > { %v1033_v17 = vpop.f32.mrf.mxu1 }
 0x14c   : > { %v1371_v15 = vadd.f32 %v1327_v10, %v1224_v8  ;;  %v1477_v35 = vpop.f32.mrf.mxu0  ;;  %v1075_v44 = vadd.f32 %v1033_v17, %v2451_v37 }
 0x14e   : > { %v1518_v18 = vadd.f32 %v1474_v42, %v1371_v15 }
 0x150   : > { %1535 = vst.msk [vmem:[%s2591_s4 + $0x10] sm:$0xff] %vm1532_vm1, %v1518_v18 }
 0x151   : > { %v1183_v36 = vpop.f32.mrf.mxu2 }
 0x152   : > { %v1225_v53 = vadd.f32 %v1183_v36, %v1075_v44  ;;  %v1330_v5 = vpop.f32.mrf.mxu3 }
 0x153   : > { %v1036_v55 = vpop.f32.mrf.mxu1 }
 0x154   : > { %v1372_v58 = vadd.f32 %v1330_v5, %v1225_v53  ;;  %v1480_v24 = vpop.f32.mrf.mxu0  ;;  %v1076_v26 = vadd.f32 %v1036_v55, %v2463_v39 }
 0x156   : > { %v1519_v28 = vadd.f32 %v1477_v35, %v1372_v58 }
 0x158   : > { %1536 = vst.msk [vmem:[%s2591_s4 + $0x18] sm:$0xff] %vm1532_vm1, %v1519_v28 }
 0x159   : > { %v1186_v22 = vpop.f32.mrf.mxu2 }
 0x15a   : > { %v1226_v46 = vadd.f32 %v1186_v22, %v1076_v26  ;;  %v1333_v57 = vpop.f32.mrf.mxu3 }
 0x15b   : > { %v1039_v32 = vpop.f32.mrf.mxu1 }
 0x15c   : > { %v1373_v37 = vadd.f32 %v1333_v57, %v1226_v46  ;;  %v1483_v21 = vpop.f32.mrf.mxu0  ;;  %v1077_v7 = vadd.f32 %v1039_v32, %v2475_v41 }
 0x15e   : > { %v1520_v38 = vadd.f32 %v1480_v24, %v1373_v37 }
 0x160   : > { %1537 = vst.msk [vmem:[%s2591_s4 + $0x20] sm:$0xff] %vm1532_vm1, %v1520_v38 }
 0x161   : > { %v1189_v47 = vpop.f32.mrf.mxu2 }
 0x162   : > { %v1227_v48 = vadd.f32 %v1189_v47, %v1077_v7  ;;  %v1336_v1 = vpop.f32.mrf.mxu3 }
 0x163   : > { %v1042_v0 = vpop.f32.mrf.mxu1 }
 0x164   : > { %v1374_v39 = vadd.f32 %v1336_v1, %v1227_v48  ;;  %v1486_v62 = vpop.f32.mrf.mxu0  ;;  %v1078_v49 = vadd.f32 %v1042_v0, %v2487_v43 }
 0x166   : > { %v1521_v14 = vadd.f32 %v1483_v21, %v1374_v39 }
 0x168   : > { %1538 = vst.msk [vmem:[%s2591_s4 + $0x28] sm:$0xff] %vm1532_vm1, %v1521_v14 }
 0x169   : > { %v1192_v50 = vpop.f32.mrf.mxu2 }
 0x16a   : > { %v1228_v16 = vadd.f32 %v1192_v50, %v1078_v49  ;;  %v1339_v2 = vpop.f32.mrf.mxu3 }
 0x16b   : > { %v1045_v6 = vpop.f32.mrf.mxu1 }
 0x16c   : > { %v1375_v41 = vadd.f32 %v1339_v2, %v1228_v16  ;;  %v1489_v19 = vpop.f32.mrf.mxu0  ;;  %v1079_v54 = vadd.f32 %v1045_v6, %v2498_v31 }
 0x16e   : > { %v1522_v52 = vadd.f32 %v1486_v62, %v1375_v41 }
 0x170   : > { %1539 = vst.msk [vmem:[%s2591_s4 + $0x30] sm:$0xff] %vm1532_vm1, %v1522_v52 }
 0x171   : > { %v1195_v56 = vpop.f32.mrf.mxu2 }
 0x172   : > { %v1229_v33 = vadd.f32 %v1195_v56, %v1079_v54  ;;  %v1342_v34 = vpop.f32.mrf.mxu3 }
 0x173   : > { %v1048_v59 = vpop.f32.mrf.mxu1 }
 0x174   : > { %v1376_v43 = vadd.f32 %v1342_v34, %v1229_v33  ;;  %v1492_v29 = vpop.f32.mrf.mxu0  ;;  %v1080_v13 = vadd.f32 %v1048_v59, %v2509_v25 }
 0x176   : > { %v1523_v23 = vadd.f32 %v1489_v19, %v1376_v43 }
 0x178   : > { %1540 = vst.msk [vmem:[%s2591_s4 + $0x38] sm:$0xff] %vm1532_vm1, %v1523_v23 }
 0x179   : > { %v1198_v63 = vpop.f32.mrf.mxu2 }
 0x17a   : > { %v1230_v20 = vadd.f32 %v1198_v63, %v1080_v13  ;;  %v1345_v60 = vpop.f32.mrf.mxu3 }
 0x17b   : > { %v1051_v11 = vpop.f32.mrf.mxu1 }
 0x17c   : > { %v1377_v31 = vadd.f32 %v1345_v60, %v1230_v20  ;;  %v1495_v42 = vpop.f32.mrf.mxu0  ;;  %v1081_v4 = vadd.f32 %v1051_v11, %v2520_v27 }
 0x17e   : > { %v1524_v12 = vadd.f32 %v1492_v29, %v1377_v31 }
 0x180   : > { %1541 = vst.msk [vmem:[%s2591_s4 + $0x40] sm:$0xff] %vm1532_vm1, %v1524_v12 }
 0x181   : > { %v1201_v30 = vpop.f32.mrf.mxu2 }
 0x182   : > { %v1231_v8 = vadd.f32 %v1201_v30, %v1081_v4  ;;  %v1348_v10 = vpop.f32.mrf.mxu3 }
 0x183   : > { %v1054_v17 = vpop.f32.mrf.mxu1 }
 0x184   : > { %v1378_v25 = vadd.f32 %v1348_v10, %v1231_v8  ;;  %v1498_v15 = vpop.f32.mrf.mxu0  ;;  %v1082_v18 = vadd.f32 %v1054_v17, %v2531_v9 }
 0x186   : > { %v1525_v35 = vadd.f32 %v1495_v42, %v1378_v25 }
 0x188   : > { %1542 = vst.msk [vmem:[%s2591_s4 + $0x48] sm:$0xff] %vm1532_vm1, %v1525_v35 }
 0x189   : > { %v1204_v44 = vpop.f32.mrf.mxu2 }
 0x18a   : > { %v1232_v36 = vadd.f32 %v1204_v44, %v1082_v18  ;;  %v1351_v53 = vpop.f32.mrf.mxu3 }
 0x18b   : > { %v1057_v5 = vpop.f32.mrf.mxu1 }
 0x18c   : > { %v1379_v27 = vadd.f32 %v1351_v53, %v1232_v36  ;;  %v1501_v55 = vpop.f32.mrf.mxu0  ;;  %v1083_v24 = vadd.f32 %v1057_v5, %v2543_v61 }
 0x18e   : > { %v1526_v58 = vadd.f32 %v1498_v15, %v1379_v27 }
 0x190   : > { %1543 = vst.msk [vmem:[%s2591_s4 + $0x50] sm:$0xff] %vm1532_vm1, %v1526_v58 }
 0x191   : > { %v1207_v28 = vpop.f32.mrf.mxu2 }
 0x192   : > { %v1233_v26 = vadd.f32 %v1207_v28, %v1083_v24  ;;  %v1354_v22 = vpop.f32.mrf.mxu3 }
 0x193   : > { %v1060_v46 = vpop.f32.mrf.mxu1 }
 0x194   : > { %v1380_v9 = vadd.f32 %v1354_v22, %v1233_v26  ;;  %v1504_v57 = vpop.f32.mrf.mxu0  ;;  %v1084_v37 = vadd.f32 %v1060_v46, %v2554_v3 }
 0x196   : > { %v1527_v32 = vadd.f32 %v1501_v55, %v1380_v9 }
 0x198   : > { %1544 = vst.msk [vmem:[%s2591_s4 + $0x58] sm:$0xff] %vm1532_vm1, %v1527_v32 }
 0x199   : > { %v1210_v21 = vpop.f32.mrf.mxu2 }
 0x19a   : > { %v1234_v38 = vadd.f32 %v1210_v21, %v1084_v37  ;;  %v1357_v7 = vpop.f32.mrf.mxu3 }
 0x19b   : > { %v1063_v47 = vpop.f32.mrf.mxu1 }
 0x19c   : > { %v1381_v61 = vadd.f32 %v1357_v7, %v1234_v38  ;;  %v1507_v1 = vpop.f32.mrf.mxu0  ;;  %v1085_v0 = vadd.f32 %v1063_v47, %v2567_v45 }
 0x19e   : > { %v1528_v48 = vadd.f32 %v1504_v57, %v1381_v61 }
 0x1a0   : > { %1545 = vst.msk [vmem:[%s2591_s4 + $0x60] sm:$0xff] %vm1532_vm1, %v1528_v48 }
 0x1a1   : > { %v1213_v39 = vpop.f32.mrf.mxu2 }
 0x1a2   : > { %v1235_v62 = vadd.f32 %v1213_v39, %v1085_v0  ;;  %v1360_v14 = vpop.f32.mrf.mxu3 }
 0x1a3   : > { %v1066_v49 = vpop.f32.mrf.mxu1 }
 0x1a4   : > { %v1382_v3 = vadd.f32 %v1360_v14, %v1235_v62  ;;  %v1086_v16 = vadd.f32 %v1066_v49, %v2578_v51  ;;  %v1510_v6 = vpop.f32.mrf.mxu0 }
 0x1a6   : > { %v1529_v50 = vadd.f32 %v1507_v1, %v1382_v3 }
 0x1a8   : > { %1546 = vst.msk [vmem:[%s2591_s4 + $0x68] sm:$0xff] %vm1532_vm1, %v1529_v50 }
 0x1a9   : > { %v1216_v2 = vpop.f32.mrf.mxu2 }
 0x1aa   : > { %v1236_v41 = vadd.f32 %v1216_v2, %v1086_v16  ;;  %v1363_v19 = vpop.f32.mrf.mxu3 }
 0x1ab   : > { %v1069_v45 = vpop.f32.mrf.mxu1 }
 0x1ac   : > { %v1383_v52 = vadd.f32 %v1363_v19, %v1236_v41  ;;  %v1087_v56 = vadd.f32 %v1069_v45, %v2585_v40  ;;  %v1513_v43 = vpop.f32.mrf.mxu0 }
 0x1ae   : > { %v1530_v54 = vadd.f32 %v1510_v6, %v1383_v52 }
 0x1b0   : > { %1547 = vst.msk [vmem:[%s2591_s4 + $0x70] sm:$0xff] %vm1532_vm1, %v1530_v54 }
 0x1b1   : > { %v1219_v33 = vpop.f32.mrf.mxu2 }
 0x1b2   : > { %v1237_v34 = vadd.f32 %v1219_v33, %v1087_v56  ;;  %v1366_v59 = vpop.f32.mrf.mxu3 }
 0x1b4   : > { %v1384_v29 = vadd.f32 %v1366_v59, %v1237_v34 }
 0x1b6   : > { %v1531_v51 = vadd.f32 %v1513_v43, %v1384_v29 }
 0x1b8   : > { %1548 = vst.msk [vmem:[%s2591_s4 + $0x78] sm:$0xff] %vm1532_vm1, %v1531_v51 }
 0x1b9 PF: > { %s13_s16 = sadd.s32 1, %s1998_s16   ;;  %s2674_s12 = smov %s1990_s14 }
 0x1ba   : > { %p10_p7 = scmp.ge.s32.totalorder %s13_s16, 6   ;;  %s2675_s13 = smov %s1994_s15 }
 0x1bb   : > { %s2676_s14 = smov %s2679_s17  ;;  %s2677_s15 = smov %s2683_s18 }
 0x1bc   :  { %12 = sbr.rel (!%p10_p7) target bundleno = 3 (0x3), region = 73 }

</bundles_post_ra>
